<compile_context>
chip_gen: v7x
topology: tpu7x:2x2x1
jax: 0.10.0
libtpu: 0.0.40
codegen_flags: <defaults>
</compile_context>

<pallas_src>
import functools

import jax
import jax.numpy as jnp
from jax.experimental import pallas as pl
from jax.experimental.pallas import tpu as pltpu

LANES = 128

# RGB -> XYZ matrix from the PyTorch module.  The row-sum normalization
# (output / M.sum(dim=2)) and the (c + 1)/2 RGB normalization are folded into
# the constants:  x = sum_j (m_ij / (2*row_i)) * c_j + 0.5   (rows sum to 1).
_M = ((0.412453, 0.357580, 0.180423),
      (0.212671, 0.715160, 0.072169),
      (0.019334, 0.119193, 0.950227))
_ROW = tuple(sum(row) for row in _M)
_MH = tuple(tuple(m / (2.0 * s) for m in row) for row, s in zip(_M, _ROW))

_LAB_THR = 0.008856
_LAB_A = 7.787
_LAB_B = 0.137931


def _round_up(x, m):
    return ((x + m - 1) // m) * m


def _cdiv(a, b):
    return -(-a // b)


# ---------------------------------------------------------------------------
# In-kernel Lab math (elementwise, VPU + EUP)
# ---------------------------------------------------------------------------
def _lab_f(t):
    # t^(1/3) via exp(log(t)/3) (EUP); linear branch below the threshold.
    cube = jnp.exp(jnp.log(jnp.maximum(t, 1e-10)) * (1.0 / 3.0))
    return jnp.where(t > _LAB_THR, cube, _LAB_A * t + _LAB_B)


def _raw_to_fxyz(r, g, b):
    """r, g, b raw network outputs in [-1, 1]; returns f(X), f(Y), f(Z)."""
    x = _MH[0][0] * r + _MH[0][1] * g + _MH[0][2] * b + 0.5
    y = _MH[1][0] * r + _MH[1][1] * g + _MH[1][2] * b + 0.5
    z = _MH[2][0] * r + _MH[2][1] * g + _MH[2][2] * b + 0.5
    return _lab_f(x), _lab_f(y), _lab_f(z)


# ---------------------------------------------------------------------------
# Pallas kernel: per-pixel Lab(a,b) L1 partial sums, accumulated into out_ref
# ---------------------------------------------------------------------------
def _lab_kernel(fake_ref, real_ref, out_ref, *, tm, rows_valid):
    i = pl.program_id(1)

    @pl.when(i == 0)
    def _():
        out_ref[...] = jnp.zeros_like(out_ref)

    # Blocks are (3, tm, 128): channel-major, pixels dense on sublane x lane.
    fr = fake_ref[0].astype(jnp.float32)
    fg = fake_ref[1].astype(jnp.float32)
    fb = fake_ref[2].astype(jnp.float32)
    rr = real_ref[0].astype(jnp.float32)
    rg = real_ref[1].astype(jnp.float32)
    rb = real_ref[2].astype(jnp.float32)

    fxf, fyf, fzf = _raw_to_fxyz(fr, fg, fb)
    fxr, fyr, fzr = _raw_to_fxyz(rr, rg, rb)

    # |a_fake - a_real| + |b_fake - b_real|, sharing the f(Y) delta.
    dfy = fyf - fyr
    d = (500.0 * jnp.abs((fxf - fxr) - dfy)
         + 200.0 * jnp.abs(dfy - (fzf - fzr)))

    def accumulate(v):
        # (tm,128) -> (tm//8, 8, 128) is layout-preserving (whole vregs);
        # the axis-0 sum is tm/8 plain VPU vector adds.
        out_ref[...] += jnp.sum(v.reshape(tm // 8, 8, LANES), axis=0)

    if rows_valid % tm == 0:
        accumulate(d)
    else:
        last = pl.num_programs(1) - 1

        @pl.when(i != last)
        def _():
            accumulate(d)

        @pl.when(i == last)
        def _():
            # Mask rows past the end of the array (Pallas partial-block pad).
            rows = jax.lax.broadcasted_iota(jnp.int32, (tm, LANES), 0) + i * tm
            accumulate(jnp.where(rows < rows_valid, d, 0.0))


# ---------------------------------------------------------------------------
# Wrapper
# ---------------------------------------------------------------------------
@functools.partial(jax.jit, static_argnames=("block_rows",))
def lab_color_loss(fake, real, block_rows=2048):
    """L1 loss between the (a, b) Lab channels of fake and real (NCHW, [-1,1])."""
    B, C, H, W = fake.shape
    assert C == 3 and real.shape == fake.shape
    HW = H * W
    N = B * HW

    # Rows of 128 pixels; pad HW to a multiple of 8*128 so R is a multiple of 8.
    # When HW is already a multiple of 1024 this is a free reshape (no copy).
    HW_pad = _round_up(HW, 8 * LANES)
    R = HW_pad // LANES

    def prep(img):
        flat = img.reshape(B, 3, HW)
        if HW_pad != HW:
            # Identical zero padding on fake and real -> exact 0 contribution.
            flat = jnp.pad(flat, ((0, 0), (0, 0), (0, HW_pad - HW)))
        return flat.reshape(B, 3, R, LANES)

    f4 = prep(fake)
    r4 = prep(real)

    tm = min(_round_up(block_rows, 8), R)   # rows per grid step (multiple of 8)
    gi = _cdiv(R, tm)                       # reduction steps per batch element

    partials = pl.pallas_call(
        functools.partial(_lab_kernel, tm=tm, rows_valid=R),
        out_shape=jax.ShapeDtypeStruct((B, 8, LANES), jnp.float32),
        grid_spec=pltpu.PrefetchScalarGridSpec(
            num_scalar_prefetch=0,
            grid=(B, gi),
            in_specs=[
                pl.BlockSpec((pl.Squeezed(), 3, tm, LANES),
                             lambda b, i: (b, 0, i, 0)),
                pl.BlockSpec((pl.Squeezed(), 3, tm, LANES),
                             lambda b, i: (b, 0, i, 0)),
            ],
            out_specs=pl.BlockSpec((pl.Squeezed(), 8, LANES),
                                   lambda b, i: (b, 0, 0)),
        ),
        compiler_params=pltpu.CompilerParams(
            dimension_semantics=("parallel", "arbitrary")),
    )(f4, r4)

    # Final scalar glue: mean over the [B, 2, H, W] abs-diff tensor.
    return jnp.sum(partials) / (2.0 * N)


# ---------------------------------------------------------------------------
# Pure-JAX reference (mirrors the PyTorch module, no Pallas)
# ---------------------------------------------------------------------------
def lab_color_loss_ref(fake, real):
    Mmat = jnp.array(_M, dtype=jnp.float32)

    def rgb2xyz(img):
        out = jnp.einsum('nc,bchw->bnhw', Mmat, img)
        return out / Mmat.sum(axis=1)[None, :, None, None]

    def f(t):
        return jnp.where(t > _LAB_THR, jnp.cbrt(t), _LAB_A * t + _LAB_B)

    def ab(xyz):
        fx, fy, fz = f(xyz[:, 0]), f(xyz[:, 1]), f(xyz[:, 2])
        return jnp.stack([500.0 * (fx - fy), 200.0 * (fy - fz)], axis=1)

    fake_ab = ab(rgb2xyz((fake + 1.0) / 2.0))
    real_ab = ab(rgb2xyz((real + 1.0) / 2.0))
    return jnp.mean(jnp.abs(fake_ab - real_ab))


if __name__ == "__main__":
    key = jax.random.PRNGKey(0)
    k1, k2 = jax.random.split(key)
    B, H, W = 2, 16, 16

    fake = jax.random.uniform(k1, (B, 3, H, W), jnp.float32, -1.0, 1.0)
    real = jax.random.uniform(k2, (B, 3, H, W), jnp.float32, -1.0, 1.0)

    loss = lab_color_loss(fake, real)
    jax.block_until_ready(loss)

    ref = lab_color_loss_ref(fake, real)
    assert jnp.isfinite(loss), loss
    assert jnp.allclose(loss, ref, rtol=2e-3, atol=1e-3), (loss, ref)

    print("KERNEL_OK")
</pallas_src>

<mosaic_0001>
module attributes {stable_mosaic.version = 11 : i64} {
  func.func @_lab_kernel(%arg0: i32, %arg1: i32, %arg2: memref<1x3x8x128xf32, #tpu.memory_space<vmem>>, %arg3: memref<1x3x8x128xf32, #tpu.memory_space<vmem>>, %arg4: memref<1x8x128xf32, #tpu.memory_space<vmem>>) attributes {dimension_semantics = [#tpu.dimension_semantics<parallel>, #tpu.dimension_semantics<arbitrary>], iteration_bounds = array<i64: 2, 1>, scalar_prefetch = 0 : i64, scratch_operands = 0 : i64, tpu.core_type = #tpu.core_type<tc>, window_params = [{transform_indices = @transform_0, window_bounds = array<i64: 1, 3, 8, 128>}, {transform_indices = @transform_1, window_bounds = array<i64: 1, 3, 8, 128>}, {transform_indices = @transform_2, window_bounds = array<i64: 1, 8, 128>}]} {
    %c0_i32 = arith.constant 0 : i32
    %0 = arith.cmpi eq, %arg1, %c0_i32 : i32
    %1 = arith.extui %0 : i1 to i32
    %c0_i32_0 = arith.constant 0 : i32
    %2 = arith.cmpi ne, %1, %c0_i32_0 : i32
    scf.if %2 {
      %cst_84 = arith.constant 0.000000e+00 : f32
      %173 = vector.broadcast %cst_84 : f32 to vector<8x128xf32>
      %c0_85 = arith.constant 0 : index
      %c0_86 = arith.constant 0 : index
      %c0_87 = arith.constant 0 : index
      %174 = vector.load %arg4[%c0_85, %c0_86, %c0_87] : memref<1x8x128xf32, #tpu.memory_space<vmem>>, vector<1x8x128xf32>
      %175 = vector.shape_cast %174 : vector<1x8x128xf32> to vector<8x128xf32>
      %176 = vector.shape_cast %173 : vector<8x128xf32> to vector<1x8x128xf32>
      tpu.vector_store %arg4[%c0_85, %c0_86, %c0_87], %176 {strides = array<i32>} : memref<1x8x128xf32, #tpu.memory_space<vmem>>, vector<1x8x128xf32>,
    } else {
    }
    %c0 = arith.constant 0 : index
    %c0_1 = arith.constant 0 : index
    %c0_2 = arith.constant 0 : index
    %c0_3 = arith.constant 0 : index
    %3 = vector.load %arg2[%c0, %c0_1, %c0_2, %c0_3] : memref<1x3x8x128xf32, #tpu.memory_space<vmem>>, vector<1x1x8x128xf32>
    %4 = vector.shape_cast %3 : vector<1x1x8x128xf32> to vector<8x128xf32>
    %c0_4 = arith.constant 0 : index
    %c1 = arith.constant 1 : index
    %c0_5 = arith.constant 0 : index
    %c0_6 = arith.constant 0 : index
    %5 = vector.load %arg2[%c0_4, %c1, %c0_5, %c0_6] : memref<1x3x8x128xf32, #tpu.memory_space<vmem>>, vector<1x1x8x128xf32>
    %6 = vector.shape_cast %5 : vector<1x1x8x128xf32> to vector<8x128xf32>
    %c0_7 = arith.constant 0 : index
    %c2 = arith.constant 2 : index
    %c0_8 = arith.constant 0 : index
    %c0_9 = arith.constant 0 : index
    %7 = vector.load %arg2[%c0_7, %c2, %c0_8, %c0_9] : memref<1x3x8x128xf32, #tpu.memory_space<vmem>>, vector<1x1x8x128xf32>
    %8 = vector.shape_cast %7 : vector<1x1x8x128xf32> to vector<8x128xf32>
    %c0_10 = arith.constant 0 : index
    %c0_11 = arith.constant 0 : index
    %c0_12 = arith.constant 0 : index
    %c0_13 = arith.constant 0 : index
    %9 = vector.load %arg3[%c0_10, %c0_11, %c0_12, %c0_13] : memref<1x3x8x128xf32, #tpu.memory_space<vmem>>, vector<1x1x8x128xf32>
    %10 = vector.shape_cast %9 : vector<1x1x8x128xf32> to vector<8x128xf32>
    %c0_14 = arith.constant 0 : index
    %c1_15 = arith.constant 1 : index
    %c0_16 = arith.constant 0 : index
    %c0_17 = arith.constant 0 : index
    %11 = vector.load %arg3[%c0_14, %c1_15, %c0_16, %c0_17] : memref<1x3x8x128xf32, #tpu.memory_space<vmem>>, vector<1x1x8x128xf32>
    %12 = vector.shape_cast %11 : vector<1x1x8x128xf32> to vector<8x128xf32>
    %c0_18 = arith.constant 0 : index
    %c2_19 = arith.constant 2 : index
    %c0_20 = arith.constant 0 : index
    %c0_21 = arith.constant 0 : index
    %13 = vector.load %arg3[%c0_18, %c2_19, %c0_20, %c0_21] : memref<1x3x8x128xf32, #tpu.memory_space<vmem>>, vector<1x1x8x128xf32>
    %14 = vector.shape_cast %13 : vector<1x1x8x128xf32> to vector<8x128xf32>
    %cst = arith.constant 0.216976374 : f32
    %15 = vector.broadcast %cst : f32 to vector<8x128xf32>
    %16 = arith.mulf %15, %4 : vector<8x128xf32>
    %cst_22 = arith.constant 0.188109711 : f32
    %17 = vector.broadcast %cst_22 : f32 to vector<8x128xf32>
    %18 = arith.mulf %17, %6 : vector<8x128xf32>
    %19 = arith.addf %16, %18 : vector<8x128xf32>
    %cst_23 = arith.constant 0.0949139148 : f32
    %20 = vector.broadcast %cst_23 : f32 to vector<8x128xf32>
    %21 = arith.mulf %20, %8 : vector<8x128xf32>
    %22 = arith.addf %19, %21 : vector<8x128xf32>
    %cst_24 = arith.constant 5.000000e-01 : f32
    %23 = vector.broadcast %cst_24 : f32 to vector<8x128xf32>
    %24 = arith.addf %22, %23 : vector<8x128xf32>
    %cst_25 = arith.constant 0.106335498 : f32
    %25 = vector.broadcast %cst_25 : f32 to vector<8x128xf32>
    %26 = arith.mulf %25, %4 : vector<8x128xf32>
    %cst_26 = arith.constant 3.575800e-01 : f32
    %27 = vector.broadcast %cst_26 : f32 to vector<8x128xf32>
    %28 = arith.mulf %27, %6 : vector<8x128xf32>
    %29 = arith.addf %26, %28 : vector<8x128xf32>
    %cst_27 = arith.constant 3.608450e-02 : f32
    %30 = vector.broadcast %cst_27 : f32 to vector<8x128xf32>
    %31 = arith.mulf %30, %8 : vector<8x128xf32>
    %32 = arith.addf %29, %31 : vector<8x128xf32>
    %cst_28 = arith.constant 5.000000e-01 : f32
    %33 = vector.broadcast %cst_28 : f32 to vector<8x128xf32>
    %34 = arith.addf %32, %33 : vector<8x128xf32>
    %cst_29 = arith.constant 0.00887895748 : f32
    %35 = vector.broadcast %cst_29 : f32 to vector<8x128xf32>
    %36 = arith.mulf %35, %4 : vector<8x128xf32>
    %cst_30 = arith.constant 0.0547382608 : f32
    %37 = vector.broadcast %cst_30 : f32 to vector<8x128xf32>
    %38 = arith.mulf %37, %6 : vector<8x128xf32>
    %39 = arith.addf %36, %38 : vector<8x128xf32>
    %cst_31 = arith.constant 0.436382771 : f32
    %40 = vector.broadcast %cst_31 : f32 to vector<8x128xf32>
    %41 = arith.mulf %40, %8 : vector<8x128xf32>
    %42 = arith.addf %39, %41 : vector<8x128xf32>
    %cst_32 = arith.constant 5.000000e-01 : f32
    %43 = vector.broadcast %cst_32 : f32 to vector<8x128xf32>
    %44 = arith.addf %42, %43 : vector<8x128xf32>
    %cst_33 = arith.constant 1.000000e-10 : f32
    %45 = vector.broadcast %cst_33 : f32 to vector<8x128xf32>
    %46 = arith.maximumf %24, %45 : vector<8x128xf32>
    %47 = math.log %46 : vector<8x128xf32>
    %cst_34 = arith.constant 0.333333343 : f32
    %48 = vector.broadcast %cst_34 : f32 to vector<8x128xf32>
    %49 = arith.mulf %47, %48 : vector<8x128xf32>
    %50 = math.exp %49 : vector<8x128xf32>
    %cst_35 = arith.constant 8.856000e-03 : f32
    %51 = vector.broadcast %cst_35 : f32 to vector<8x128xf32>
    %52 = arith.cmpf ogt, %24, %51 : vector<8x128xf32>
    %cst_36 = arith.constant 7.787000e+00 : f32
    %53 = vector.broadcast %cst_36 : f32 to vector<8x128xf32>
    %54 = arith.mulf %53, %24 : vector<8x128xf32>
    %cst_37 = arith.constant 1.379310e-01 : f32
    %55 = vector.broadcast %cst_37 : f32 to vector<8x128xf32>
    %56 = arith.addf %54, %55 : vector<8x128xf32>
    %57 = arith.select %52, %50, %56 : vector<8x128xi1>, vector<8x128xf32>
    %cst_38 = arith.constant 1.000000e-10 : f32
    %58 = vector.broadcast %cst_38 : f32 to vector<8x128xf32>
    %59 = arith.maximumf %34, %58 : vector<8x128xf32>
    %60 = math.log %59 : vector<8x128xf32>
    %cst_39 = arith.constant 0.333333343 : f32
    %61 = vector.broadcast %cst_39 : f32 to vector<8x128xf32>
    %62 = arith.mulf %60, %61 : vector<8x128xf32>
    %63 = math.exp %62 : vector<8x128xf32>
    %cst_40 = arith.constant 8.856000e-03 : f32
    %64 = vector.broadcast %cst_40 : f32 to vector<8x128xf32>
    %65 = arith.cmpf ogt, %34, %64 : vector<8x128xf32>
    %cst_41 = arith.constant 7.787000e+00 : f32
    %66 = vector.broadcast %cst_41 : f32 to vector<8x128xf32>
    %67 = arith.mulf %66, %34 : vector<8x128xf32>
    %cst_42 = arith.constant 1.379310e-01 : f32
    %68 = vector.broadcast %cst_42 : f32 to vector<8x128xf32>
    %69 = arith.addf %67, %68 : vector<8x128xf32>
    %70 = arith.select %65, %63, %69 : vector<8x128xi1>, vector<8x128xf32>
    %cst_43 = arith.constant 1.000000e-10 : f32
    %71 = vector.broadcast %cst_43 : f32 to vector<8x128xf32>
    %72 = arith.maximumf %44, %71 : vector<8x128xf32>
    %73 = math.log %72 : vector<8x128xf32>
    %cst_44 = arith.constant 0.333333343 : f32
    %74 = vector.broadcast %cst_44 : f32 to vector<8x128xf32>
    %75 = arith.mulf %73, %74 : vector<8x128xf32>
    %76 = math.exp %75 : vector<8x128xf32>
    %cst_45 = arith.constant 8.856000e-03 : f32
    %77 = vector.broadcast %cst_45 : f32 to vector<8x128xf32>
    %78 = arith.cmpf ogt, %44, %77 : vector<8x128xf32>
    %cst_46 = arith.constant 7.787000e+00 : f32
    %79 = vector.broadcast %cst_46 : f32 to vector<8x128xf32>
    %80 = arith.mulf %79, %44 : vector<8x128xf32>
    %cst_47 = arith.constant 1.379310e-01 : f32
    %81 = vector.broadcast %cst_47 : f32 to vector<8x128xf32>
    %82 = arith.addf %80, %81 : vector<8x128xf32>
    %83 = arith.select %78, %76, %82 : vector<8x128xi1>, vector<8x128xf32>
    %cst_48 = arith.constant 0.216976374 : f32
    %84 = vector.broadcast %cst_48 : f32 to vector<8x128xf32>
    %85 = arith.mulf %84, %10 : vector<8x128xf32>
    %cst_49 = arith.constant 0.188109711 : f32
    %86 = vector.broadcast %cst_49 : f32 to vector<8x128xf32>
    %87 = arith.mulf %86, %12 : vector<8x128xf32>
    %88 = arith.addf %85, %87 : vector<8x128xf32>
    %cst_50 = arith.constant 0.0949139148 : f32
    %89 = vector.broadcast %cst_50 : f32 to vector<8x128xf32>
    %90 = arith.mulf %89, %14 : vector<8x128xf32>
    %91 = arith.addf %88, %90 : vector<8x128xf32>
    %cst_51 = arith.constant 5.000000e-01 : f32
    %92 = vector.broadcast %cst_51 : f32 to vector<8x128xf32>
    %93 = arith.addf %91, %92 : vector<8x128xf32>
    %cst_52 = arith.constant 0.106335498 : f32
    %94 = vector.broadcast %cst_52 : f32 to vector<8x128xf32>
    %95 = arith.mulf %94, %10 : vector<8x128xf32>
    %cst_53 = arith.constant 3.575800e-01 : f32
    %96 = vector.broadcast %cst_53 : f32 to vector<8x128xf32>
    %97 = arith.mulf %96, %12 : vector<8x128xf32>
    %98 = arith.addf %95, %97 : vector<8x128xf32>
    %cst_54 = arith.constant 3.608450e-02 : f32
    %99 = vector.broadcast %cst_54 : f32 to vector<8x128xf32>
    %100 = arith.mulf %99, %14 : vector<8x128xf32>
    %101 = arith.addf %98, %100 : vector<8x128xf32>
    %cst_55 = arith.constant 5.000000e-01 : f32
    %102 = vector.broadcast %cst_55 : f32 to vector<8x128xf32>
    %103 = arith.addf %101, %102 : vector<8x128xf32>
    %cst_56 = arith.constant 0.00887895748 : f32
    %104 = vector.broadcast %cst_56 : f32 to vector<8x128xf32>
    %105 = arith.mulf %104, %10 : vector<8x128xf32>
    %cst_57 = arith.constant 0.0547382608 : f32
    %106 = vector.broadcast %cst_57 : f32 to vector<8x128xf32>
    %107 = arith.mulf %106, %12 : vector<8x128xf32>
    %108 = arith.addf %105, %107 : vector<8x128xf32>
    %cst_58 = arith.constant 0.436382771 : f32
    %109 = vector.broadcast %cst_58 : f32 to vector<8x128xf32>
    %110 = arith.mulf %109, %14 : vector<8x128xf32>
    %111 = arith.addf %108, %110 : vector<8x128xf32>
    %cst_59 = arith.constant 5.000000e-01 : f32
    %112 = vector.broadcast %cst_59 : f32 to vector<8x128xf32>
    %113 = arith.addf %111, %112 : vector<8x128xf32>
    %cst_60 = arith.constant 1.000000e-10 : f32
    %114 = vector.broadcast %cst_60 : f32 to vector<8x128xf32>
    %115 = arith.maximumf %93, %114 : vector<8x128xf32>
    %116 = math.log %115 : vector<8x128xf32>
    %cst_61 = arith.constant 0.333333343 : f32
    %117 = vector.broadcast %cst_61 : f32 to vector<8x128xf32>
    %118 = arith.mulf %116, %117 : vector<8x128xf32>
    %119 = math.exp %118 : vector<8x128xf32>
    %cst_62 = arith.constant 8.856000e-03 : f32
    %120 = vector.broadcast %cst_62 : f32 to vector<8x128xf32>
    %121 = arith.cmpf ogt, %93, %120 : vector<8x128xf32>
    %cst_63 = arith.constant 7.787000e+00 : f32
    %122 = vector.broadcast %cst_63 : f32 to vector<8x128xf32>
    %123 = arith.mulf %122, %93 : vector<8x128xf32>
    %cst_64 = arith.constant 1.379310e-01 : f32
    %124 = vector.broadcast %cst_64 : f32 to vector<8x128xf32>
    %125 = arith.addf %123, %124 : vector<8x128xf32>
    %126 = arith.select %121, %119, %125 : vector<8x128xi1>, vector<8x128xf32>
    %cst_65 = arith.constant 1.000000e-10 : f32
    %127 = vector.broadcast %cst_65 : f32 to vector<8x128xf32>
    %128 = arith.maximumf %103, %127 : vector<8x128xf32>
    %129 = math.log %128 : vector<8x128xf32>
    %cst_66 = arith.constant 0.333333343 : f32
    %130 = vector.broadcast %cst_66 : f32 to vector<8x128xf32>
    %131 = arith.mulf %129, %130 : vector<8x128xf32>
    %132 = math.exp %131 : vector<8x128xf32>
    %cst_67 = arith.constant 8.856000e-03 : f32
    %133 = vector.broadcast %cst_67 : f32 to vector<8x128xf32>
    %134 = arith.cmpf ogt, %103, %133 : vector<8x128xf32>
    %cst_68 = arith.constant 7.787000e+00 : f32
    %135 = vector.broadcast %cst_68 : f32 to vector<8x128xf32>
    %136 = arith.mulf %135, %103 : vector<8x128xf32>
    %cst_69 = arith.constant 1.379310e-01 : f32
    %137 = vector.broadcast %cst_69 : f32 to vector<8x128xf32>
    %138 = arith.addf %136, %137 : vector<8x128xf32>
    %139 = arith.select %134, %132, %138 : vector<8x128xi1>, vector<8x128xf32>
    %cst_70 = arith.constant 1.000000e-10 : f32
    %140 = vector.broadcast %cst_70 : f32 to vector<8x128xf32>
    %141 = arith.maximumf %113, %140 : vector<8x128xf32>
    %142 = math.log %141 : vector<8x128xf32>
    %cst_71 = arith.constant 0.333333343 : f32
    %143 = vector.broadcast %cst_71 : f32 to vector<8x128xf32>
    %144 = arith.mulf %142, %143 : vector<8x128xf32>
    %145 = math.exp %144 : vector<8x128xf32>
    %cst_72 = arith.constant 8.856000e-03 : f32
    %146 = vector.broadcast %cst_72 : f32 to vector<8x128xf32>
    %147 = arith.cmpf ogt, %113, %146 : vector<8x128xf32>
    %cst_73 = arith.constant 7.787000e+00 : f32
    %148 = vector.broadcast %cst_73 : f32 to vector<8x128xf32>
    %149 = arith.mulf %148, %113 : vector<8x128xf32>
    %cst_74 = arith.constant 1.379310e-01 : f32
    %150 = vector.broadcast %cst_74 : f32 to vector<8x128xf32>
    %151 = arith.addf %149, %150 : vector<8x128xf32>
    %152 = arith.select %147, %145, %151 : vector<8x128xi1>, vector<8x128xf32>
    %153 = arith.subf %70, %139 : vector<8x128xf32>
    %154 = arith.subf %57, %126 : vector<8x128xf32>
    %155 = arith.subf %154, %153 : vector<8x128xf32>
    %156 = math.absf %155 : vector<8x128xf32>
    %cst_75 = arith.constant 5.000000e+02 : f32
    %157 = vector.broadcast %cst_75 : f32 to vector<8x128xf32>
    %158 = arith.mulf %157, %156 : vector<8x128xf32>
    %159 = arith.subf %83, %152 : vector<8x128xf32>
    %160 = arith.subf %153, %159 : vector<8x128xf32>
    %161 = math.absf %160 : vector<8x128xf32>
    %cst_76 = arith.constant 2.000000e+02 : f32
    %162 = vector.broadcast %cst_76 : f32 to vector<8x128xf32>
    %163 = arith.mulf %162, %161 : vector<8x128xf32>
    %164 = arith.addf %158, %163 : vector<8x128xf32>
    %c0_77 = arith.constant 0 : index
    %c0_78 = arith.constant 0 : index
    %c0_79 = arith.constant 0 : index
    %165 = vector.load %arg4[%c0_77, %c0_78, %c0_79] : memref<1x8x128xf32, #tpu.memory_space<vmem>>, vector<1x8x128xf32>
    %166 = vector.shape_cast %165 : vector<1x8x128xf32> to vector<8x128xf32>
    %167 = vector.shape_cast %164 : vector<8x128xf32> to vector<1x8x128xf32>
    %cst_80 = arith.constant dense<0.000000e+00> : vector<8x128xf32>
    %168 = vector.multi_reduction <add>, %167, %cst_80 [0] : vector<1x8x128xf32> to vector<8x128xf32>
    %169 = arith.addf %166, %168 : vector<8x128xf32>
    %c0_81 = arith.constant 0 : index
    %c0_82 = arith.constant 0 : index
    %c0_83 = arith.constant 0 : index
    %170 = vector.load %arg4[%c0_81, %c0_82, %c0_83] : memref<1x8x128xf32, #tpu.memory_space<vmem>>, vector<1x8x128xf32>
    %171 = vector.shape_cast %170 : vector<1x8x128xf32> to vector<8x128xf32>
    %172 = vector.shape_cast %169 : vector<8x128xf32> to vector<1x8x128xf32>
    tpu.vector_store %arg4[%c0_81, %c0_82, %c0_83], %172 {strides = array<i32>} : memref<1x8x128xf32, #tpu.memory_space<vmem>>, vector<1x8x128xf32>,
    return
  }
  func.func @transform_0(%arg0: i32, %arg1: i32) -> (i32, i32, i32, i32) {
    %c0_i32 = arith.constant 0 : i32
    %c0_i32_0 = arith.constant 0 : i32
    %c0_i32_1 = arith.constant 0 : i32
    return %arg0, %c0_i32, %arg1, %c0_i32_0 : i32, i32, i32, i32
  }
  func.func @transform_1(%arg0: i32, %arg1: i32) -> (i32, i32, i32, i32) {
    %c0_i32 = arith.constant 0 : i32
    %c0_i32_0 = arith.constant 0 : i32
    %c0_i32_1 = arith.constant 0 : i32
    return %arg0, %c0_i32, %arg1, %c0_i32_0 : i32, i32, i32, i32
  }
  func.func @transform_2(%arg0: i32, %arg1: i32) -> (i32, i32, i32) {
    %c0_i32 = arith.constant 0 : i32
    %c0_i32_0 = arith.constant 0 : i32
    %c0_i32_1 = arith.constant 0 : i32
    return %arg0, %c0_i32, %c0_i32_0 : i32, i32, i32
  }
}

</mosaic_0001>

<bundles_post_ra>
// kernel: lab_color_loss.1
= control target key start
LH: loop header
LB: loop body
LE: loop exit
PB: predicated region body
PF: predicated region fallthrough
CT: control target
= control target key end

     0   :  { %s509_s9 = smov 0   ;;  %s511_s10 = smov 0   ;;  %s579_s0 = inlined_call_operand.vmem [shape: f32[2,3,8,128], index: 0, kind: input, shape index: {}]   ;;  %s580_s1 = inlined_call_operand.vmem [shape: f32[2,3,8,128], index: 1, kind: input, shape index: {}]   ;;  %s581_s2 = inlined_call_operand.vmem [shape: f32[2,8,128], index: 2, kind: output, shape index: {}]  }
   0x1   :  { %s513_s11 = smov 0  }
   0x2 LB: > { %s24_s12 = sadd.s32 1, %s488_s10  ;;  %p410_p0 = scmp.ge.s32.totalorder %s492_s11, 1  ;;  %s492_s11 = sphi %s513_s11, %s12_s11   ;;  %s488_s10 = sphi %s511_s10, %s583_s10   ;;  %s484_s9 = sphi %s509_s9, %s582_s9  }
   0x3   : > { %p26_p1 = scmp.ge.s32.totalorder %s24_s12, 2  ;;  %p144_p2 = scmp.lt.s32.totalorder %s492_s11, 3 }
   0x5   : > { %s585_s12 = smov (%p26_p1, %s24_s12), 0  ;;  %p145_p3 = pnand %p410_p0, %p144_p2 }
   0x6   : > { %p176_p4 = scmp.lt.s32.totalorder (!%p145_p3), %s484_s9, 1 }
   0x7   : > { %148 = sbr.rel (%p145_p3) target bundleno = 75 (0x4b), region = 28 }
   0xe   : > { %s587_s9 = smov (!%p176_p4, %s484_s9), 1 }
   0xf   : > { %s420_s13 = smul.u32 24, %s587_s9  ;;  %s413_s20 = sshll.u32 %s587_s9, 3 }
  0x10   : > { %s195_s23 = scalar_lea.vmem %s581_s2, %s413_s20 }
  0x11   : > { %s183_s16 = scalar_lea.vmem %s579_s0, %s420_s13  ;;  %s191_s19 = scalar_lea.vmem %s580_s1, %s420_s13 }
  0x12   : > { %v201_v0 = vld [vmem:[%s183_s16] sm:$0xff]  ;;  %v414_v1 = vld [vmem:[%s183_s16 + $0x8] sm:$0xff]  ;;  %v415_v2 = vld [vmem:[%s183_s16 + $0x10] sm:$0xff] }
  0x13   : > { %v206_v3 = vld [vmem:[%s191_s19] sm:$0xff]  ;;  %v416_v4 = vld [vmem:[%s191_s19 + $0x8] sm:$0xff]  ;;  %v417_v5 = vld [vmem:[%s191_s19 + $0x10] sm:$0xff]  ;;  %v211_v6 = vmul.f32 0.21697637, %v201_v0 }
  0x14   : > { %v212_v7 = vmul.f32 0.18810971, %v414_v1  ;;  %v214_v8 = vmul.f32 0.094913915, %v415_v2  ;;  %v217_v9 = vmul.f32 0.1063355, %v201_v0 }
  0x15   : > { %v218_v10 = vmul.f32 0.35758, %v414_v1  ;;  %v220_v11 = vmul.f32 0.0360845, %v415_v2  ;;  %v223_v12 = vmul.f32 0.0088789575, %v201_v0 }
  0x16   : > { %v213_v13 = vadd.f32 %v212_v7, %v211_v6  ;;  %v224_v14 = vmul.f32 0.05473826, %v414_v1  ;;  %v226_v15 = vmul.f32 0.43638277, %v415_v2  ;;  %v259_v16 = vmul.f32 0.21697637, %v206_v3 }
  0x17   : > { %v219_v17 = vadd.f32 %v218_v10, %v217_v9  ;;  %v260_v18 = vmul.f32 0.18810971, %v416_v4  ;;  %v262_v19 = vmul.f32 0.094913915, %v417_v5  ;;  %v265_v20 = vmul.f32 0.1063355, %v206_v3 }
  0x18   : > { %v215_v21 = vadd.f32 %v214_v8, %v213_v13  ;;  %v225_v22 = vadd.f32 %v224_v14, %v223_v12  ;;  %v266_v23 = vmul.f32 0.35758, %v416_v4  ;;  %v268_v24 = vmul.f32 0.0360845, %v417_v5 }
  0x19   : > { %v221_v25 = vadd.f32 %v220_v11, %v219_v17  ;;  %v261_v26 = vadd.f32 %v260_v18, %v259_v16  ;;  %v271_v27 = vmul.f32 0.0088789575, %v206_v3  ;;  %v272_v28 = vmul.f32 0.05473826, %v416_v4 }
  0x1a   : > { %v536_v29 = vadd.f32 0.5, %v215_v21  ;;  %v227_v30 = vadd.f32 %v226_v15, %v225_v22  ;;  %v267_v31 = vadd.f32 %v266_v23, %v265_v20  ;;  %v274_v32 = vmul.f32 0.43638277, %v417_v5 }
  0x1b   : > { %v538_v33 = vadd.f32 0.5, %v221_v25  ;;  %v263_v34 = vadd.f32 %v262_v19, %v261_v26  ;;  %v273_v35 = vadd.f32 %v272_v28, %v271_v27 }
  0x1c   : > { %v540_v36 = vadd.f32 0.5, %v227_v30  ;;  %v229_v37 = vmax.f32 %v536_v29, 1e-10  ;;  %v269_v38 = vadd.f32 %v268_v24, %v267_v31  ;;  %v236_v8 = vmul.f32 7.787, %v536_v29 }
  0x1d   : > { %v239_v39 = vmax.f32 %v538_v33, 1e-10  ;;  %v544_v40 = vadd.f32 0.5, %v263_v34  ;;  %v275_v41 = vadd.f32 %v274_v32, %v273_v35  ;;  %v246_v9 = vmul.f32 7.787, %v538_v33 }
  0x1e   : > { %446 = vlog2.f32 %v229_v37  ;;  %v249_v42 = vmax.f32 %v540_v36, 1e-10  ;;  %v547_v43 = vadd.f32 0.5, %v269_v38  ;;  %v256_v10 = vmul.f32 7.787, %v540_v36 }
  0x1f   : > { %448 = vlog2.f32 %v239_v39  ;;  %v549_v44 = vadd.f32 0.5, %v275_v41  ;;  %v277_v45 = vmax.f32 %v544_v40, 1e-10  ;;  %v284_v11 = vmul.f32 7.787, %v544_v40 }
  0x20   : > { %450 = vlog2.f32 %v249_v42  ;;  %v287_v46 = vmax.f32 %v547_v43, 1e-10  ;;  %v294_v12 = vmul.f32 7.787, %v547_v43  ;;  %v237_v13 = vadd.f32 0.137931, %v236_v8 }
  0x21   : > { %452 = vlog2.f32 %v277_v45  ;;  %v297_v47 = vmax.f32 %v549_v44, 1e-10  ;;  %v304_v14 = vmul.f32 7.787, %v549_v44  ;;  %vm235_vm0 = vcmp.gt.f32.partialorder %v536_v29, 0.008856 }
  0x22   : > { %454 = vlog2.f32 %v287_v46  ;;  %v247_v15 = vadd.f32 0.137931, %v246_v9  ;;  %vm245_vm1 = vcmp.gt.f32.partialorder %v538_v33, 0.008856  ;;  %v257_v17 = vadd.f32 0.137931, %v256_v10 }
  0x23   : > { %456 = vlog2.f32 %v297_v47  ;;  %v285_v18 = vadd.f32 0.137931, %v284_v11  ;;  %vm255_vm2 = vcmp.gt.f32.partialorder %v540_v36, 0.008856  ;;  %vm283_vm3 = vcmp.gt.f32.partialorder %v544_v40, 0.008856 }
  0x24   : > { %v295_v20 = vadd.f32 0.137931, %v294_v12  ;;  %vm293_vm4 = vcmp.gt.f32.partialorder %v547_v43, 0.008856  ;;  %v305_v23 = vadd.f32 0.137931, %v304_v14 }
  0x25   : > { %vm303_vm5 = vcmp.gt.f32.partialorder %v549_v44, 0.008856 }
  0x28   : > { %v447_v48 = vpop.eup %446 }
  0x29   : > { %v449_v49 = vpop.eup %448  ;;  %v231_v50 = vmul.f32 0.6931472, %v447_v48 }
  0x2a   : > { %v451_v51 = vpop.eup %450  ;;  %v241_v52 = vmul.f32 0.6931472, %v449_v49 }
  0x2b   : > { %v453_v53 = vpop.eup %452  ;;  %v232_v54 = vmul.f32 0.33333334, %v231_v50  ;;  %v251_v55 = vmul.f32 0.6931472, %v451_v51 }
  0x2c   : > { %v455_v56 = vpop.eup %454  ;;  %v242_v57 = vmul.f32 0.33333334, %v241_v52  ;;  %v279_v58 = vmul.f32 0.6931472, %v453_v53 }
  0x2d   : > { %v457_v59 = vpop.eup %456  ;;  %v233_v60 = vmul.f32 1.442695, %v232_v54  ;;  %v252_v61 = vmul.f32 0.33333334, %v251_v55  ;;  %v289_v62 = vmul.f32 0.6931472, %v455_v56 }
  0x2e   : > { %v243_v63 = vmul.f32 1.442695, %v242_v57  ;;  %v280_v0 = vmul.f32 0.33333334, %v279_v58  ;;  %v299_v1 = vmul.f32 0.6931472, %v457_v59 }
  0x2f   : > { %458 = vpow2.f32 %v233_v60  ;;  %v253_v2 = vmul.f32 1.442695, %v252_v61  ;;  %v290_v3 = vmul.f32 0.33333334, %v289_v62 }
  0x30   : > { %460 = vpow2.f32 %v243_v63  ;;  %v281_v4 = vmul.f32 1.442695, %v280_v0  ;;  %v300_v5 = vmul.f32 0.33333334, %v299_v1 }
  0x31   : > { %462 = vpow2.f32 %v253_v2  ;;  %v291_v6 = vmul.f32 1.442695, %v290_v3 }
  0x32   : > { %464 = vpow2.f32 %v281_v4  ;;  %v301_v7 = vmul.f32 1.442695, %v300_v5 }
  0x33   : > { %466 = vpow2.f32 %v291_v6 }
  0x34   : > { %468 = vpow2.f32 %v301_v7 }
  0x39   : > { %v459_v16 = vpop.eup %458 }
  0x3a   : > { %v461_v19 = vpop.eup %460  ;;  %v238_v22 = vsel %vm235_vm0, %v459_v16, %v237_v13 }
  0x3b   : > { %v463_v21 = vpop.eup %462  ;;  %v248_v25 = vsel %vm245_vm1, %v461_v19, %v247_v15 }
  0x3c   : > { %v465_v24 = vpop.eup %464  ;;  %v258_v27 = vsel %vm255_vm2, %v463_v21, %v257_v17 }
  0x3d   : > { %v467_v26 = vpop.eup %466  ;;  %v286_v28 = vsel %vm283_vm3, %v465_v24, %v285_v18 }
  0x3e   : > { %v469_v29 = vpop.eup %468  ;;  %v296_v30 = vsel %vm293_vm4, %v467_v26, %v295_v20  ;;  %v308_v31 = vsub.f32 %v238_v22, %v286_v28 }
  0x3f   : > { %v306_v32 = vsel %vm303_vm5, %v469_v29, %v305_v23  ;;  %v307_v33 = vsub.f32 %v248_v25, %v296_v30 }
  0x40   : > { %v312_v34 = vsub.f32 %v258_v27, %v306_v32 }
  0x41   : > { %v309_v35 = vsub.f32 %v308_v31, %v307_v33 }
  0x42   : > { %v313_v36 = vsub.f32 %v307_v33, %v312_v34 }
  0x43   : > { %v310_v37 = vand.u32 2147483647, %v309_v35 }
  0x44   : > { %v314_v38 = vand.u32 2147483647, %v313_v36 }
  0x45   : > { %v311_v39 = vmul.f32 500.0, %v310_v37 }
  0x46   : > { %v315_v40 = vmul.f32 200.0, %v314_v38 }
  0x48   : > { %v316_v41 = vadd.f32 %v315_v40, %v311_v39 }
  0x4a   : > { %320 = vst [vmem:[%s195_s23] sm:$0xff] %v316_v41 }
  0x4b PF: > { %s12_s11 = sadd.s32 1, %s492_s11   ;;  %s582_s9 = smov %s488_s10 }
  0x4c   : > { %p9_p5 = scmp.ge.s32.totalorder %s12_s11, 4   ;;  %s583_s10 = smov %s585_s12 }
  0x4e   :  { %11 = sbr.rel (!%p9_p5) target bundleno = 2 (0x2), region = 69 }

</bundles_post_ra>
